<compile_context>
chip_gen: v7x
topology: tpu7x:2x2x1
jax: 0.10.0
libtpu: 0.0.40
codegen_flags: <defaults>
</compile_context>

<pallas_src>
import functools

import jax
import jax.numpy as jnp
from jax import lax
from jax.experimental import pallas as pl
from jax.experimental.pallas import tpu as pltpu

BN_EPS = 1e-5


def _round_up(n, m):
    return ((n + m - 1) // m) * m


def _pad2d(a, rows, cols):
    return jnp.pad(a, ((0, rows - a.shape[0]), (0, cols - a.shape[1])))


def _vmem_capacity_bytes():
    try:
        return int(pltpu.get_tpu_info().vmem_capacity_bytes)
    except Exception:
        return 64 * 1024 * 1024  # conservative (v7x-sized) fallback


def _choose_tb(n_rows, per_row_bytes, resident_bytes, budget_bytes, cap=1024):
    """Largest batch tile (multiple of 16) whose streaming buffers fit VMEM."""
    tb = _round_up(min(max(n_rows, 16), cap), 16)
    budget = budget_bytes - resident_bytes
    while tb > 16 and tb * per_row_bytes > budget:
        tb = _round_up(max(tb // 2, 16), 16)
    return tb


# ----------------------------------------------------------------------------
# Fused path: one pallas_call, h kept in a persistent VMEM scratch.
# ----------------------------------------------------------------------------
def _fused_kernel(x_ref, w1_ref, b1_ref, gamma_ref, beta_ref, w2_ref, b2_ref,
                  o_ref, h_vmem, s_ref, ss_ref, scale_ref, shift_ref,
                  *, tb, inv_n):
    p = pl.program_id(0)   # phase: 0 = fc1 + stats, 1 = BN affine + ReLU + fc2
    i = pl.program_id(1)   # batch tile
    row0 = pl.multiple_of(i * tb, 16)

    @pl.when((p == 0) & (i == 0))
    def _init():
        s_ref[...] = jnp.zeros_like(s_ref)
        ss_ref[...] = jnp.zeros_like(ss_ref)

    @pl.when(p == 0)
    def _fc1_stats():
        # Stats are accumulated on h WITHOUT the bias: zero-padded batch rows
        # (x == 0) then contribute exactly 0, so no masking is needed, and the
        # b1 offset is removed from the E[h^2] - E[h]^2 cancellation.
        hc = jnp.dot(x_ref[...], w1_ref[...], preferred_element_type=jnp.float32)
        h_vmem[pl.ds(row0, tb), :] = (hc + b1_ref[...]).astype(h_vmem.dtype)
        s_ref[...] += jnp.sum(hc, axis=0, keepdims=True)
        ss_ref[...] += jnp.sum(hc * hc, axis=0, keepdims=True)

    @pl.when((p == 1) & (i == 0))
    def _fold():
        # Fold training-mode BN (biased variance) into one per-feature affine.
        mean_c = s_ref[...] * inv_n                       # mean of (h - b1)
        var = jnp.maximum(ss_ref[...] * inv_n - mean_c * mean_c, 0.0)
        scale = gamma_ref[...] * lax.rsqrt(var + BN_EPS)  # EUP, essentially free
        scale_ref[...] = scale
        shift_ref[...] = beta_ref[...] - (mean_c + b1_ref[...]) * scale

    @pl.when(p == 1)
    def _bn_relu_fc2():
        h = h_vmem[pl.ds(row0, tb), :].astype(jnp.float32)
        a = jnp.maximum(h * scale_ref[...] + shift_ref[...], 0.0)
        out = jnp.dot(a.astype(w2_ref.dtype), w2_ref[...],
                      preferred_element_type=jnp.float32)
        o_ref[...] = (out + b2_ref[...]).astype(o_ref.dtype)


# ----------------------------------------------------------------------------
# Two-pass fallback (h too large for VMEM): bf16 h via HBM, per-tile stats.
# ----------------------------------------------------------------------------
def _fc1_stats_kernel(x_ref, w1_ref, b1_ref, h_ref, s_ref, ss_ref, *, hp):
    hc = jnp.dot(x_ref[...], w1_ref[...], preferred_element_type=jnp.float32)
    h_ref[...] = (hc + b1_ref[...]).astype(h_ref.dtype)
    tb = hc.shape[0]
    # Per-tile partial sums, reduced to 8 sublane-resident rows (VALU adds);
    # final reduction happens in plain JAX. Keeps the batch axis "parallel".
    hc3 = hc.reshape(tb // 8, 8, hp)
    s_ref[...] = jnp.sum(hc3, axis=0)
    ss_ref[...] = jnp.sum(hc3 * hc3, axis=0)


def _bn_relu_fc2_kernel(h_ref, scale_ref, shift_ref, w2_ref, b2_ref, o_ref):
    h = h_ref[...].astype(jnp.float32)
    a = jnp.maximum(h * scale_ref[...] + shift_ref[...], 0.0)
    out = jnp.dot(a.astype(w2_ref.dtype), w2_ref[...],
                  preferred_element_type=jnp.float32)
    o_ref[...] = (out + b2_ref[...]).astype(o_ref.dtype)


def predictor_forward(x, w1, b1, gamma, beta, w2, b2, *, block_b=None,
                      matmul_dtype=jnp.bfloat16, h_dtype=jnp.bfloat16,
                      mode="auto"):
    """x: (B, D_in) -> (B, D_out). Matches Predictor.forward (BN in training mode)."""
    B, D_in = x.shape
    H = w1.shape[1]
    D_out = w2.shape[1]

    # Lane-dense feature dims (multiples of 128); batch tiled in multiples of 16.
    Dp_in = _round_up(D_in, 128)
    Hp = _round_up(H, 128)
    Dp_out = _round_up(D_out, 128)

    mm_bytes = jnp.dtype(matmul_dtype).itemsize
    h_bytes = jnp.dtype(h_dtype).itemsize
    out_bytes = jnp.dtype(x.dtype).itemsize
    inv_n = 1.0 / float(B)

    # Generation-aware VMEM budget (v5e/v6e: 128 MiB, v7x: 64 MiB physical).
    vmem_cap = _vmem_capacity_bytes()
    vmem_limit = max(32 * 1024 * 1024, min(int(0.70 * vmem_cap), 96 * 1024 * 1024))
    budget = vmem_limit - 4 * 1024 * 1024   # headroom for compiler scratch

    w_resident = (Dp_in * Hp + Hp * Dp_out) * mm_bytes
    vec_resident = (5 * Hp + Dp_out) * 4

    def _norm_tb(tb):
        return max(16, _round_up(min(tb, _round_up(B, 16)), 16))

    # Weights / per-feature vectors (shared by both paths).
    w1_p = _pad2d(w1, Dp_in, Hp).astype(matmul_dtype)
    w2_p = _pad2d(w2, Hp, Dp_out).astype(matmul_dtype)
    b1_p = jnp.pad(b1, (0, Hp - H)).reshape(1, Hp).astype(jnp.float32)
    gamma_p = jnp.pad(gamma, (0, Hp - H)).reshape(1, Hp).astype(jnp.float32)
    beta_p = jnp.pad(beta, (0, Hp - H)).reshape(1, Hp).astype(jnp.float32)
    b2_p = jnp.pad(b2, (0, Dp_out - D_out)).reshape(1, Dp_out).astype(jnp.float32)

    # ---- Decide fused (h in VMEM) vs two-pass (h via HBM) ----------------------
    B16 = _round_up(B, 16)
    fused_resident = w_resident + vec_resident + B16 * Hp * h_bytes
    fused_per_row = 2 * Dp_in * mm_bytes + 2 * Dp_out * out_bytes + Hp * h_bytes
    if mode == "fused":
        use_fused = True
    elif mode == "two_pass":
        use_fused = False
    else:
        use_fused = (fused_resident + 16 * fused_per_row) <= budget

    if use_fused:
        tb = _norm_tb(block_b) if block_b else _choose_tb(
            B, fused_per_row, fused_resident, budget)
        Bp = _round_up(B, tb)
        nb = Bp // tb
        x_p = _pad2d(x, Bp, Dp_in).astype(matmul_dtype)

        kernel = functools.partial(_fused_kernel, tb=tb, inv_n=inv_n)
        out_p = pl.pallas_call(
            kernel,
            out_shape=jax.ShapeDtypeStruct((Bp, Dp_out), x.dtype),
            grid=(2, nb),
            in_specs=[
                # x: real tiles in phase 0; parked on the last tile in phase 1
                # (no re-fetches during phase 1).
                pl.BlockSpec((tb, Dp_in),
                             lambda p, i: (i * (1 - p) + (nb - 1) * p, 0)),
                pl.BlockSpec((Dp_in, Hp), lambda p, i: (0, 0)),
                pl.BlockSpec((1, Hp), lambda p, i: (0, 0)),
                pl.BlockSpec((1, Hp), lambda p, i: (0, 0)),
                pl.BlockSpec((1, Hp), lambda p, i: (0, 0)),
                pl.BlockSpec((Hp, Dp_out), lambda p, i: (0, 0)),
                pl.BlockSpec((1, Dp_out), lambda p, i: (0, 0)),
            ],
            # Output parked on block 0 in phase 0 (never written / never flushed
            # there), real tiles in phase 1.
            out_specs=pl.BlockSpec((tb, Dp_out), lambda p, i: (i * p, 0)),
            scratch_shapes=[
                pltpu.VMEM((Bp, Hp), h_dtype),          # persistent h
                pltpu.VMEM((1, Hp), jnp.float32),       # sum(h - b1)
                pltpu.VMEM((1, Hp), jnp.float32),       # sum((h - b1)^2)
                pltpu.VMEM((1, Hp), jnp.float32),       # BN scale
                pltpu.VMEM((1, Hp), jnp.float32),       # BN shift
            ],
            compiler_params=pltpu.CompilerParams(
                dimension_semantics=("arbitrary", "arbitrary"),
                vmem_limit_bytes=vmem_limit),
            cost_estimate=pl.CostEstimate(
                flops=2 * Bp * Hp * (Dp_in + Dp_out),
                transcendentals=Hp,
                bytes_accessed=(Bp * Dp_in * mm_bytes + w_resident
                                + Bp * Dp_out * out_bytes + 6 * Hp * 4)),
        )(x_p, w1_p, b1_p, gamma_p, beta_p, w2_p, b2_p)
        return out_p[:B, :D_out]

    # ---- Two-pass fallback ------------------------------------------------------
    res1 = Dp_in * Hp * mm_bytes + Hp * 4
    per_row1 = 2 * (Dp_in * mm_bytes + Hp * h_bytes)
    res2 = Hp * Dp_out * mm_bytes + (2 * Hp + Dp_out) * 4
    per_row2 = 2 * (Hp * h_bytes + Dp_out * out_bytes)
    tb = _norm_tb(block_b) if block_b else min(
        _choose_tb(B, per_row1, res1, budget),
        _choose_tb(B, per_row2, res2, budget))
    Bp = _round_up(B, tb)
    nb = Bp // tb
    x_p = _pad2d(x, Bp, Dp_in).astype(matmul_dtype)

    # Pass 1: fc1 (bf16 h to HBM) + per-tile partial stats; batch axis parallel.
    h, ps, pss = pl.pallas_call(
        functools.partial(_fc1_stats_kernel, hp=Hp),
        out_shape=(jax.ShapeDtypeStruct((Bp, Hp), h_dtype),
                   jax.ShapeDtypeStruct((nb * 8, Hp), jnp.float32),
                   jax.ShapeDtypeStruct((nb * 8, Hp), jnp.float32)),
        grid=(nb,),
        in_specs=[pl.BlockSpec((tb, Dp_in), lambda i: (i, 0)),
                  pl.BlockSpec((Dp_in, Hp), lambda i: (0, 0)),
                  pl.BlockSpec((1, Hp), lambda i: (0, 0))],
        out_specs=(pl.BlockSpec((tb, Hp), lambda i: (i, 0)),
                   pl.BlockSpec((8, Hp), lambda i: (i, 0)),
                   pl.BlockSpec((8, Hp), lambda i: (i, 0))),
        compiler_params=pltpu.CompilerParams(
            dimension_semantics=("parallel",),
            vmem_limit_bytes=vmem_limit),
        cost_estimate=pl.CostEstimate(
            flops=2 * Bp * Dp_in * Hp,
            transcendentals=0,
            bytes_accessed=(Bp * Dp_in * mm_bytes + Dp_in * Hp * mm_bytes
                            + Bp * Hp * h_bytes + 2 * nb * 8 * Hp * 4)),
    )(x_p, w1_p, b1_p)

    # Fold training-mode BN (biased variance) into one per-feature affine.
    mean_c = jnp.sum(ps, axis=0, keepdims=True) * inv_n           # mean of (h - b1)
    var = jnp.maximum(jnp.sum(pss, axis=0, keepdims=True) * inv_n
                      - mean_c * mean_c, 0.0)
    scale = gamma_p * lax.rsqrt(var + BN_EPS)
    shift = beta_p - (mean_c + b1_p) * scale

    # Pass 2: BN affine + ReLU + fc2, parallel over batch tiles.
    out_p = pl.pallas_call(
        _bn_relu_fc2_kernel,
        out_shape=jax.ShapeDtypeStruct((Bp, Dp_out), x.dtype),
        grid=(nb,),
        in_specs=[pl.BlockSpec((tb, Hp), lambda i: (i, 0)),
                  pl.BlockSpec((1, Hp), lambda i: (0, 0)),
                  pl.BlockSpec((1, Hp), lambda i: (0, 0)),
                  pl.BlockSpec((Hp, Dp_out), lambda i: (0, 0)),
                  pl.BlockSpec((1, Dp_out), lambda i: (0, 0))],
        out_specs=pl.BlockSpec((tb, Dp_out), lambda i: (i, 0)),
        compiler_params=pltpu.CompilerParams(
            dimension_semantics=("parallel",),
            vmem_limit_bytes=vmem_limit),
        cost_estimate=pl.CostEstimate(
            flops=2 * Bp * Hp * Dp_out + 3 * Bp * Hp,
            transcendentals=0,
            bytes_accessed=(Bp * Hp * h_bytes + Hp * Dp_out * mm_bytes
                            + Bp * Dp_out * out_bytes + 2 * Hp * 4 + Dp_out * 4)),
    )(h, scale, shift, w2_p, b2_p)

    return out_p[:B, :D_out]


def reference_forward(x, w1, b1, gamma, beta, w2, b2, matmul_dtype=jnp.bfloat16):
    """PyTorch semantics (training-mode BN) using the same bf16 matmul operands."""
    cast = lambda a: a.astype(matmul_dtype).astype(jnp.float32)
    h = cast(x) @ cast(w1) + b1
    mean = h.mean(axis=0, keepdims=True)
    var = ((h - mean) ** 2).mean(axis=0, keepdims=True)
    h = (h - mean) * lax.rsqrt(var + BN_EPS) * gamma + beta
    h = jnp.maximum(h, 0.0)
    return cast(h) @ cast(w2) + b2


if __name__ == "__main__":
    # Small shapes consistent with the module (input_dim -> hidden_dim -> output_dim).
    # B is intentionally not a multiple of the batch tile to exercise padding.
    B, D_IN, HID, D_OUT = 24, 32, 16, 32

    key = jax.random.PRNGKey(0)
    kx, k1, k2, k3, k4 = jax.random.split(key, 5)

    x = jax.random.normal(kx, (B, D_IN), dtype=jnp.float32)
    lim1 = 1.0 / (D_IN ** 0.5)
    w1 = jax.random.uniform(k1, (D_IN, HID), minval=-lim1, maxval=lim1, dtype=jnp.float32)
    b1 = jax.random.uniform(k2, (HID,), minval=-lim1, maxval=lim1, dtype=jnp.float32)
    lim2 = 1.0 / (HID ** 0.5)
    w2 = jax.random.uniform(k3, (HID, D_OUT), minval=-lim2, maxval=lim2, dtype=jnp.float32)
    b2 = jax.random.uniform(k4, (HID if False else D_OUT,), minval=-lim2, maxval=lim2,
                            dtype=jnp.float32)
    # BatchNorm1d affine init: gamma=1, beta=0.
    gamma = jnp.ones((HID,), dtype=jnp.float32)
    beta = jnp.zeros((HID,), dtype=jnp.float32)

    ref = reference_forward(x, w1, b1, gamma, beta, w2, b2)

    # block_b=16 -> 2 batch tiles: exercises h persistence / cross-tile stats.
    for mode in ("fused", "two_pass"):
        out = predictor_forward(x, w1, b1, gamma, beta, w2, b2, block_b=16, mode=mode)
        out = jax.block_until_ready(out)
        assert out.shape == (B, D_OUT)
        max_err = float(jnp.max(jnp.abs(out - ref)))
        assert jnp.allclose(out, ref, atol=2e-2, rtol=2e-2), (
            f"[{mode}] mismatch vs reference: max abs err = {max_err}")

    print("KERNEL_OK")
</pallas_src>

<mosaic_0001>
module attributes {stable_mosaic.version = 11 : i64} {
  func.func @_fused_kernel(%arg0: i32, %arg1: i32, %arg2: memref<16x128xbf16, #tpu.memory_space<vmem>>, %arg3: memref<128x128xbf16, #tpu.memory_space<vmem>>, %arg4: memref<1x128xf32, #tpu.memory_space<vmem>>, %arg5: memref<1x128xf32, #tpu.memory_space<vmem>>, %arg6: memref<1x128xf32, #tpu.memory_space<vmem>>, %arg7: memref<128x128xbf16, #tpu.memory_space<vmem>>, %arg8: memref<1x128xf32, #tpu.memory_space<vmem>>, %arg9: memref<16x128xf32, #tpu.memory_space<vmem>>, %arg10: memref<32x128xbf16, #tpu.memory_space<vmem>>, %arg11: memref<1x128xf32, #tpu.memory_space<vmem>>, %arg12: memref<1x128xf32, #tpu.memory_space<vmem>>, %arg13: memref<1x128xf32, #tpu.memory_space<vmem>>, %arg14: memref<1x128xf32, #tpu.memory_space<vmem>>) attributes {dimension_semantics = [#tpu.dimension_semantics<arbitrary>, #tpu.dimension_semantics<arbitrary>], iteration_bounds = array<i64: 2, 2>, scalar_prefetch = 0 : i64, scratch_operands = 5 : i64, tpu.core_type = #tpu.core_type<tc>, window_params = [{transform_indices = @transform_0, window_bounds = array<i64: 16, 128>}, {pipeline_mode = #tpu.pipeline_mode<synchronous>, transform_indices = @transform_1, window_bounds = array<i64: 128, 128>}, {pipeline_mode = #tpu.pipeline_mode<synchronous>, transform_indices = @transform_2, window_bounds = array<i64: 1, 128>}, {pipeline_mode = #tpu.pipeline_mode<synchronous>, transform_indices = @transform_3, window_bounds = array<i64: 1, 128>}, {pipeline_mode = #tpu.pipeline_mode<synchronous>, transform_indices = @transform_4, window_bounds = array<i64: 1, 128>}, {pipeline_mode = #tpu.pipeline_mode<synchronous>, transform_indices = @transform_5, window_bounds = array<i64: 128, 128>}, {pipeline_mode = #tpu.pipeline_mode<synchronous>, transform_indices = @transform_6, window_bounds = array<i64: 1, 128>}, {transform_indices = @transform_7, window_bounds = array<i64: 16, 128>}]} {
    %c16_i32 = arith.constant 16 : i32
    %0 = arith.muli %arg1, %c16_i32 : i32
    %1 = tpu.assume_multiple %0, 16 : i32
    %c0_i32 = arith.constant 0 : i32
    %2 = arith.cmpi eq, %arg0, %c0_i32 : i32
    %c0_i32_0 = arith.constant 0 : i32
    %3 = arith.cmpi eq, %arg1, %c0_i32_0 : i32
    %4 = arith.andi %2, %3 : i1
    %5 = arith.extui %4 : i1 to i32
    %c0_i32_1 = arith.constant 0 : i32
    %6 = arith.cmpi ne, %5, %c0_i32_1 : i32
    scf.if %6 {
      %cst = arith.constant 0.000000e+00 : f32
      %18 = vector.broadcast %cst : f32 to vector<1x128xf32>
      %c0 = arith.constant 0 : index
      %c0_8 = arith.constant 0 : index
      %19 = vector.load %arg11[%c0, %c0_8] : memref<1x128xf32, #tpu.memory_space<vmem>>, vector<1x128xf32>
      tpu.vector_store %arg11[%c0, %c0_8], %18 {strides = array<i32>} : memref<1x128xf32, #tpu.memory_space<vmem>>, vector<1x128xf32>,
      %cst_9 = arith.constant 0.000000e+00 : f32
      %20 = vector.broadcast %cst_9 : f32 to vector<1x128xf32>
      %c0_10 = arith.constant 0 : index
      %c0_11 = arith.constant 0 : index
      %21 = vector.load %arg12[%c0_10, %c0_11] : memref<1x128xf32, #tpu.memory_space<vmem>>, vector<1x128xf32>
      tpu.vector_store %arg12[%c0_10, %c0_11], %20 {strides = array<i32>} : memref<1x128xf32, #tpu.memory_space<vmem>>, vector<1x128xf32>,
    } else {
    }
    %c0_i32_2 = arith.constant 0 : i32
    %7 = arith.cmpi eq, %arg0, %c0_i32_2 : i32
    %8 = arith.extui %7 : i1 to i32
    %c0_i32_3 = arith.constant 0 : i32
    %9 = arith.cmpi ne, %8, %c0_i32_3 : i32
    scf.if %9 {
      %c0 = arith.constant 0 : index
      %c0_8 = arith.constant 0 : index
      %18 = vector.load %arg2[%c0, %c0_8] : memref<16x128xbf16, #tpu.memory_space<vmem>>, vector<16x128xbf16>
      %c0_9 = arith.constant 0 : index
      %c0_10 = arith.constant 0 : index
      %19 = vector.load %arg3[%c0_9, %c0_10] : memref<128x128xbf16, #tpu.memory_space<vmem>>, vector<128x128xbf16>
      %cst = arith.constant dense<0.000000e+00> : vector<16x128xf32>
      %20 = tpu.matmul %18, %19, %cst {dimension_numbers = #tpu.dot_dimension_numbers<[1], [0], [0], [1], [0, 0, 1, 1], [], []>} : vector<16x128xbf16>, vector<128x128xbf16>, vector<16x128xf32> -> vector<16x128xf32>
      %c0_11 = arith.constant 0 : index
      %c0_12 = arith.constant 0 : index
      %21 = vector.load %arg4[%c0_11, %c0_12] : memref<1x128xf32, #tpu.memory_space<vmem>>, vector<1x128xf32>
      %22 = vector.broadcast %21 : vector<1x128xf32> to vector<16x128xf32>
      %23 = arith.addf %20, %22 : vector<16x128xf32>
      %24 = arith.truncf %23 : vector<16x128xf32> to vector<16x128xbf16>
      %25 = arith.index_cast %1 : i32 to index
      %c0_13 = arith.constant 0 : index
      %26 = vector.load %arg10[%25, %c0_13] : memref<32x128xbf16, #tpu.memory_space<vmem>>, vector<16x128xbf16>
      tpu.vector_store %arg10[%25, %c0_13], %24 {strides = array<i32>} : memref<32x128xbf16, #tpu.memory_space<vmem>>, vector<16x128xbf16>,
      %c0_14 = arith.constant 0 : index
      %c0_15 = arith.constant 0 : index
      %27 = vector.load %arg11[%c0_14, %c0_15] : memref<1x128xf32, #tpu.memory_space<vmem>>, vector<1x128xf32>
      %cst_16 = arith.constant dense<0.000000e+00> : vector<128xf32>
      %28 = vector.multi_reduction <add>, %20, %cst_16 [0] : vector<16x128xf32> to vector<128xf32>
      %29 = vector.shape_cast %28 : vector<128xf32> to vector<1x128xf32>
      %30 = arith.addf %27, %29 : vector<1x128xf32>
      %c0_17 = arith.constant 0 : index
      %c0_18 = arith.constant 0 : index
      %31 = vector.load %arg11[%c0_17, %c0_18] : memref<1x128xf32, #tpu.memory_space<vmem>>, vector<1x128xf32>
      tpu.vector_store %arg11[%c0_17, %c0_18], %30 {strides = array<i32>} : memref<1x128xf32, #tpu.memory_space<vmem>>, vector<1x128xf32>,
      %c0_19 = arith.constant 0 : index
      %c0_20 = arith.constant 0 : index
      %32 = vector.load %arg12[%c0_19, %c0_20] : memref<1x128xf32, #tpu.memory_space<vmem>>, vector<1x128xf32>
      %33 = arith.mulf %20, %20 : vector<16x128xf32>
      %cst_21 = arith.constant dense<0.000000e+00> : vector<128xf32>
      %34 = vector.multi_reduction <add>, %33, %cst_21 [0] : vector<16x128xf32> to vector<128xf32>
      %35 = vector.shape_cast %34 : vector<128xf32> to vector<1x128xf32>
      %36 = arith.addf %32, %35 : vector<1x128xf32>
      %c0_22 = arith.constant 0 : index
      %c0_23 = arith.constant 0 : index
      %37 = vector.load %arg12[%c0_22, %c0_23] : memref<1x128xf32, #tpu.memory_space<vmem>>, vector<1x128xf32>
      tpu.vector_store %arg12[%c0_22, %c0_23], %36 {strides = array<i32>} : memref<1x128xf32, #tpu.memory_space<vmem>>, vector<1x128xf32>,
    } else {
    }
    %c1_i32 = arith.constant 1 : i32
    %10 = arith.cmpi eq, %arg0, %c1_i32 : i32
    %c0_i32_4 = arith.constant 0 : i32
    %11 = arith.cmpi eq, %arg1, %c0_i32_4 : i32
    %12 = arith.andi %10, %11 : i1
    %13 = arith.extui %12 : i1 to i32
    %c0_i32_5 = arith.constant 0 : i32
    %14 = arith.cmpi ne, %13, %c0_i32_5 : i32
    scf.if %14 {
      %c0 = arith.constant 0 : index
      %c0_8 = arith.constant 0 : index
      %18 = vector.load %arg11[%c0, %c0_8] : memref<1x128xf32, #tpu.memory_space<vmem>>, vector<1x128xf32>
      %cst = arith.constant 0.0416666679 : f32
      %19 = vector.broadcast %cst : f32 to vector<1x128xf32>
      %20 = arith.mulf %18, %19 : vector<1x128xf32>
      %c0_9 = arith.constant 0 : index
      %c0_10 = arith.constant 0 : index
      %21 = vector.load %arg12[%c0_9, %c0_10] : memref<1x128xf32, #tpu.memory_space<vmem>>, vector<1x128xf32>
      %cst_11 = arith.constant 0.0416666679 : f32
      %22 = vector.broadcast %cst_11 : f32 to vector<1x128xf32>
      %23 = arith.mulf %21, %22 : vector<1x128xf32>
      %24 = arith.mulf %20, %20 : vector<1x128xf32>
      %25 = arith.subf %23, %24 : vector<1x128xf32>
      %cst_12 = arith.constant 0.000000e+00 : f32
      %26 = vector.broadcast %cst_12 : f32 to vector<1x128xf32>
      %27 = arith.maximumf %25, %26 : vector<1x128xf32>
      %c0_13 = arith.constant 0 : index
      %c0_14 = arith.constant 0 : index
      %28 = vector.load %arg5[%c0_13, %c0_14] : memref<1x128xf32, #tpu.memory_space<vmem>>, vector<1x128xf32>
      %cst_15 = arith.constant 9.99999974E-6 : f32
      %29 = vector.broadcast %cst_15 : f32 to vector<1x128xf32>
      %30 = arith.addf %27, %29 : vector<1x128xf32>
      %31 = math.rsqrt %30 : vector<1x128xf32>
      %32 = arith.mulf %28, %31 : vector<1x128xf32>
      %c0_16 = arith.constant 0 : index
      %c0_17 = arith.constant 0 : index
      %33 = vector.load %arg13[%c0_16, %c0_17] : memref<1x128xf32, #tpu.memory_space<vmem>>, vector<1x128xf32>
      tpu.vector_store %arg13[%c0_16, %c0_17], %32 {strides = array<i32>} : memref<1x128xf32, #tpu.memory_space<vmem>>, vector<1x128xf32>,
      %c0_18 = arith.constant 0 : index
      %c0_19 = arith.constant 0 : index
      %34 = vector.load %arg6[%c0_18, %c0_19] : memref<1x128xf32, #tpu.memory_space<vmem>>, vector<1x128xf32>
      %c0_20 = arith.constant 0 : index
      %c0_21 = arith.constant 0 : index
      %35 = vector.load %arg4[%c0_20, %c0_21] : memref<1x128xf32, #tpu.memory_space<vmem>>, vector<1x128xf32>
      %36 = arith.addf %20, %35 : vector<1x128xf32>
      %37 = arith.mulf %36, %32 : vector<1x128xf32>
      %38 = arith.subf %34, %37 : vector<1x128xf32>
      %c0_22 = arith.constant 0 : index
      %c0_23 = arith.constant 0 : index
      %39 = vector.load %arg14[%c0_22, %c0_23] : memref<1x128xf32, #tpu.memory_space<vmem>>, vector<1x128xf32>
      tpu.vector_store %arg14[%c0_22, %c0_23], %38 {strides = array<i32>} : memref<1x128xf32, #tpu.memory_space<vmem>>, vector<1x128xf32>,
    } else {
    }
    %c1_i32_6 = arith.constant 1 : i32
    %15 = arith.cmpi eq, %arg0, %c1_i32_6 : i32
    %16 = arith.extui %15 : i1 to i32
    %c0_i32_7 = arith.constant 0 : i32
    %17 = arith.cmpi ne, %16, %c0_i32_7 : i32
    scf.if %17 {
      %18 = arith.index_cast %1 : i32 to index
      %c0 = arith.constant 0 : index
      %19 = vector.load %arg10[%18, %c0] : memref<32x128xbf16, #tpu.memory_space<vmem>>, vector<16x128xbf16>
      %20 = arith.extf %19 : vector<16x128xbf16> to vector<16x128xf32>
      %c0_8 = arith.constant 0 : index
      %c0_9 = arith.constant 0 : index
      %21 = vector.load %arg13[%c0_8, %c0_9] : memref<1x128xf32, #tpu.memory_space<vmem>>, vector<1x128xf32>
      %22 = vector.broadcast %21 : vector<1x128xf32> to vector<16x128xf32>
      %23 = arith.mulf %20, %22 : vector<16x128xf32>
      %c0_10 = arith.constant 0 : index
      %c0_11 = arith.constant 0 : index
      %24 = vector.load %arg14[%c0_10, %c0_11] : memref<1x128xf32, #tpu.memory_space<vmem>>, vector<1x128xf32>
      %25 = vector.broadcast %24 : vector<1x128xf32> to vector<16x128xf32>
      %26 = arith.addf %23, %25 : vector<16x128xf32>
      %cst = arith.constant 0.000000e+00 : f32
      %27 = vector.broadcast %cst : f32 to vector<16x128xf32>
      %28 = arith.maximumf %26, %27 : vector<16x128xf32>
      %29 = arith.truncf %28 : vector<16x128xf32> to vector<16x128xbf16>
      %c0_12 = arith.constant 0 : index
      %c0_13 = arith.constant 0 : index
      %30 = vector.load %arg7[%c0_12, %c0_13] : memref<128x128xbf16, #tpu.memory_space<vmem>>, vector<128x128xbf16>
      %cst_14 = arith.constant dense<0.000000e+00> : vector<16x128xf32>
      %31 = tpu.matmul %29, %30, %cst_14 {dimension_numbers = #tpu.dot_dimension_numbers<[1], [0], [0], [1], [0, 0, 1, 1], [], []>} : vector<16x128xbf16>, vector<128x128xbf16>, vector<16x128xf32> -> vector<16x128xf32>
      %c0_15 = arith.constant 0 : index
      %c0_16 = arith.constant 0 : index
      %32 = vector.load %arg8[%c0_15, %c0_16] : memref<1x128xf32, #tpu.memory_space<vmem>>, vector<1x128xf32>
      %33 = vector.broadcast %32 : vector<1x128xf32> to vector<16x128xf32>
      %34 = arith.addf %31, %33 : vector<16x128xf32>
      %c0_17 = arith.constant 0 : index
      %c0_18 = arith.constant 0 : index
      %35 = vector.load %arg9[%c0_17, %c0_18] : memref<16x128xf32, #tpu.memory_space<vmem>>, vector<16x128xf32>
      tpu.vector_store %arg9[%c0_17, %c0_18], %34 {strides = array<i32>} : memref<16x128xf32, #tpu.memory_space<vmem>>, vector<16x128xf32>,
    } else {
    }
    return
  }
  func.func @transform_0(%arg0: i32, %arg1: i32) -> (i32, i32) {
    %c1_i32 = arith.constant 1 : i32
    %0 = arith.subi %c1_i32, %arg0 : i32
    %1 = arith.muli %arg1, %0 : i32
    %c1_i32_0 = arith.constant 1 : i32
    %2 = arith.muli %c1_i32_0, %arg0 : i32
    %3 = arith.addi %1, %2 : i32
    %c0_i32 = arith.constant 0 : i32
    %c0_i32_1 = arith.constant 0 : i32
    return %3, %c0_i32 : i32, i32
  }
  func.func @transform_1(%arg0: i32, %arg1: i32) -> (i32, i32) {
    %c0_i32 = arith.constant 0 : i32
    %c0_i32_0 = arith.constant 0 : i32
    %c0_i32_1 = arith.constant 0 : i32
    return %c0_i32, %c0_i32_0 : i32, i32
  }
  func.func @transform_2(%arg0: i32, %arg1: i32) -> (i32, i32) {
    %c0_i32 = arith.constant 0 : i32
    %c0_i32_0 = arith.constant 0 : i32
    %c0_i32_1 = arith.constant 0 : i32
    return %c0_i32, %c0_i32_0 : i32, i32
  }
  func.func @transform_3(%arg0: i32, %arg1: i32) -> (i32, i32) {
    %c0_i32 = arith.constant 0 : i32
    %c0_i32_0 = arith.constant 0 : i32
    %c0_i32_1 = arith.constant 0 : i32
    return %c0_i32, %c0_i32_0 : i32, i32
  }
  func.func @transform_4(%arg0: i32, %arg1: i32) -> (i32, i32) {
    %c0_i32 = arith.constant 0 : i32
    %c0_i32_0 = arith.constant 0 : i32
    %c0_i32_1 = arith.constant 0 : i32
    return %c0_i32, %c0_i32_0 : i32, i32
  }
  func.func @transform_5(%arg0: i32, %arg1: i32) -> (i32, i32) {
    %c0_i32 = arith.constant 0 : i32
    %c0_i32_0 = arith.constant 0 : i32
    %c0_i32_1 = arith.constant 0 : i32
    return %c0_i32, %c0_i32_0 : i32, i32
  }
  func.func @transform_6(%arg0: i32, %arg1: i32) -> (i32, i32) {
    %c0_i32 = arith.constant 0 : i32
    %c0_i32_0 = arith.constant 0 : i32
    %c0_i32_1 = arith.constant 0 : i32
    return %c0_i32, %c0_i32_0 : i32, i32
  }
  func.func @transform_7(%arg0: i32, %arg1: i32) -> (i32, i32) {
    %0 = arith.muli %arg1, %arg0 : i32
    %c0_i32 = arith.constant 0 : i32
    %c0_i32_0 = arith.constant 0 : i32
    return %0, %c0_i32 : i32, i32
  }
}

</mosaic_0001>

<bundles_post_ra>
// kernel: tpu_custom_call.1
= control target key start
LH: loop header
LB: loop body
LE: loop exit
PB: predicated region body
PF: predicated region fallthrough
CT: control target
= control target key end

     0   :  { %s1686_s0 = inlined_call_operand.hbm [shape: bf16[32,128], index: 0, kind: input, shape index: {}]   ;;  %s1687_s1 = inlined_call_operand.hbm [shape: bf16[128,128], index: 1, kind: input, shape index: {}]   ;;  %s1688_s2 = inlined_call_operand.vmem [shape: f32[1,128], index: 2, kind: input, shape index: {}]   ;;  %s1689_s3 = inlined_call_operand.vmem [shape: f32[1,128], index: 3, kind: input, shape index: {}]   ;;  %s1690_s4 = inlined_call_operand.vmem [shape: f32[1,128], index: 4, kind: input, shape index: {}]   ;;  %s1691_s5 = inlined_call_operand.hbm [shape: bf16[128,128], index: 5, kind: input, shape index: {}]   ;;  %s1692_s6 = inlined_call_operand.vmem [shape: f32[1,128], index: 6, kind: input, shape index: {}]   ;;  %s1693_s7 = inlined_call_operand.hbm [shape: f32[32,128], index: 7, kind: output, shape index: {}]  }
   0x1   :  { %1708 = sst [smem:[#allocation23_spill]] %s1687_s1 }
   0x2   :  { %1709 = sst [smem:[#allocation24_spill]] %s1688_s2 }
   0x3   :  { %1710 = sst [smem:[#allocation25_spill]] %s1689_s3 }
   0x4   :  { %1711 = sst [smem:[#allocation26_spill]] %s1690_s4 }
   0x5   :  { %1712 = sst [smem:[#allocation27_spill]] %s1691_s5 }
   0x6   :  { %1713 = sst [smem:[#allocation28_spill]] %s1692_s6 }
   0x7   :  { %1714 = sst [smem:[#allocation29_spill]] %s1693_s7 }
   0x8   :  { %12 = vsyncpa [#allocation8], 0 }
   0x9   :  { %14 = vsyncpa [#allocation8 + $0x1], 0 }
   0xa   :  { %15 = vsyncpa [#allocation11], 0 }
   0xb   :  { %16 = vsyncpa [#allocation9], 0 }
   0xc   :  { %18 = vsyncpa [#allocation9 + $0x1], 0  ;;  %s1332_s24 = smov 0   ;;  %s1334_s25 = smov 0  }
   0xd   :  { %s1336_s26 = smov 0   ;;  %s1338_s27 = smov 0  }
   0xe   :  { %s1340_s28 = smov 0   ;;  %s1342_s29 = smov 0  }
   0xf   :  { %s1344_s30 = smov 0   ;;  %s1346_s8 = smov 0  }
  0x10   :  { %s1348_s9 = smov 0   ;;  %s1350_s10 = smov 0  }
  0x11   :  { %s1352_s11 = smov 0  }
  0x12 LB: > { %1715 = sst [smem:[#allocation17_spill]] %s1237_s24  ;;  %s809_s12 = sadd.s32 4294967295, %s1277_s11   ;;  %s1277_s11 = sphi %s1352_s11, %s24_s11   ;;  %s1273_s10 = sphi %s1350_s10, %s1762_s10   ;;  %s1269_s9 = sphi %s1348_s9, %s1761_s9   ;;  %s1265_s8 = sphi %s1346_s8, %s1754_s8   ;;  %s1261_s30 = sphi %s1344_s30, %s1753_s30   ;;  %s1257_s29 = sphi %s1342_s29, %s1760_s29   ;;  %s1253_s28 = sphi %s1340_s28, %s1759_s28   ;;  %s1249_s27 = sphi %s1338_s27, %s1758_s27   ;;  %s1245_s26 = sphi %s1336_s26, %s1757_s26   ;;  %s1241_s25 = sphi %s1334_s25, %s1756_s25   ;;  %s1237_s24 = sphi %s1332_s24, %s1755_s24  }
  0x13   : > { %1716 = sst [smem:[#allocation18_spill]] %s1265_s8  ;;  %s810_s13 = sadd.s32 4294967294, %s1277_s11  }
  0x14   : > { %1717 = sst [smem:[#allocation19_spill]] %s1269_s9  ;;  %p62_p0 = scmp.ne.s32.totalorder %s1253_s28, %s1249_s27 }
  0x15   : > { %1718 = sst [smem:[#allocation20_spill]] %s1273_s10  ;;  %p1388_p1 = scmp.eq.s32.totalorder %s809_s12, 0 }
  0x16   : > { %p213_p2 = scmp.ne.s32.totalorder %s1245_s26, %s1241_s25  ;;  %p214_p4 = scmp.eq.s32.totalorder %s809_s12, 3 }
  0x17   : > { %s1719_s14 = scalar_select %p1388_p1, 1, 0 }
  0x18   : > { %p1397_p3 = por %p1388_p1, %p62_p0  ;;  %p219_p5 = scmp.ne.s32.totalorder %s1241_s25, %s1237_s24 }
  0x19   : > { %p220_p6 = scmp.eq.s32.totalorder %s810_s13, 3  ;;  %p1403_p7 = por %p214_p4, %p213_p2 }
  0x1a   : > { %s1720_s16 = scalar_select %p1397_p3, 1, 0 }
  0x1b   : > { %s1721_s17 = scalar_select %p1403_p7, 1, 0 }
  0x1c   : > { %p811_p8 = scmp.ge.s32.totalorder %s1277_s11, 1  ;;  %p1408_p9 = por %p220_p6, %p219_p5 }
  0x1d   : > { %1722 = sst [smem:[#allocation21_spill]] %s1721_s17  ;;  %p227_p10 = scmp.lt.s32.totalorder %s1277_s11, 5 }
  0x1e   : > { %s1723_s18 = scalar_select %p1408_p9, 1, 0 }
  0x1f   : > { %p1413_p11 = pnand %p811_p8, %p227_p10  ;;  %s1279_s20 = smov [#allocation10]  }
  0x20   : > { %1724 = sst [smem:[#allocation22_spill]] %s1723_s18  ;;  %s239_s21 = sshll.u32 %s1279_s20, 4  ;;  %s240_s21 = int_to_ptr.vmem [resolvable:$true] %s239_s21 }
  0x21   : > { %s1725_s19 = scalar_select %p1413_p11, 1, 0 }
  0x22   : > { %p926_p12 = pneg %p1413_p11  ;;  %s1280_s23 = smov [#allocation12]  }
  0x23   : > { %s261_s27 = sshll.u32 %s1280_s23, 4  ;;  %s1727_s1 = sld [smem:[#allocation23_spill]]  ;;  %s1425_s27 = int_to_ptr.vmem [resolvable:$true] %s261_s27 }
  0x24   : > { %p1421_p13 = pnand %p926_p12, %p1388_p1 }
  0x26   : > { %p1067_p2 = pneg %p1421_p13 }
  0x29   : > { %s1065_s15 = scalar_lea.hbm %s1727_s1, 1024 }
  0x2a   : > { %p1066_p0 = scmp.ne.s32.totalorder %s1727_s1, %s1065_s15  ;;  %p1072_p6 = scmp.lt.u32.totalorder %s1065_s15, %s1727_s1 }
  0x2c   : > { %p1068_p4 = pnand %p1067_p2, %p1066_p0 }
  0x2e   : > { %p1069_p5 = pneg %p1068_p4 }
  0x30   : > { %p1074_p8 = pnand %p1072_p6, %p1069_p5 }
  0x32   : > { %1077 = shalt.err (!%p1074_p8)
}
  0x33   : > { %s1078_s23 = scalar_lea.vmem %s240_s21, 1024  ;;  %p1086_p7 = scmp.lt.s32.totalorder %s240_s21, %s240_s21 }
  0x34   : > { %p1079_p10 = scmp.ne.s32.totalorder %s240_s21, %s1078_s23  ;;  %p1087_p1 = scmp.lt.s32.totalorder %s1078_s23, %s1078_s23 }
  0x36   : > { %p1081_p12 = pnand %p1079_p10, %p1067_p2  ;;  %p1088_p3 = por %p1087_p1, %p1086_p7 }
  0x38   : > { %p1082_p9 = pneg %p1081_p12 }
  0x3a   : > { %p1089_p11 = pnand %p1088_p3, %p1082_p9 }
  0x3c   : > { %1092 = shalt.err (!%p1089_p11)
}
  0x3d   : > { %s1704_s18 = smov 64   ;;  %s1705_s12 = smov 4  }
  0x3e   : > { %929 = dma.hbm_to_vmem [thread:$0]  (!%p1421_p13), %s1727_s1, 1024, %s240_s21, [#allocation11], %s1704_s18, %s1704_s18, %s1705_s12  }
  0x3f   : > { %s1728_s5 = sld [smem:[#allocation27_spill]] }
  0x45   : > { %s1093_s20 = scalar_lea.hbm %s1728_s5, 1024 }
  0x46   : > { %p1094_p1 = scmp.ne.s32.totalorder %s1728_s5, %s1093_s20  ;;  %p1100_p9 = scmp.lt.u32.totalorder %s1093_s20, %s1728_s5 }
  0x48   : > { %p1096_p3 = pnand %p1094_p1, %p1067_p2 }
  0x4a   : > { %p1097_p7 = pneg %p1096_p3 }
  0x4c   : > { %p1102_p11 = pnand %p1100_p9, %p1097_p7 }
  0x4e   : > { %1105 = shalt.err (!%p1102_p11)
}
  0x4f   : > { %s1106_s21 = scalar_lea.vmem %s1425_s27, 1024  ;;  %p1114_p6 = scmp.lt.s32.totalorder %s1425_s27, %s1425_s27 }
  0x50   : > { %p1107_p0 = scmp.ne.s32.totalorder %s1425_s27, %s1106_s21  ;;  %p1115_p8 = scmp.lt.s32.totalorder %s1106_s21, %s1106_s21 }
  0x52   : > { %p1109_p4 = pnand %p1107_p0, %p1067_p2  ;;  %p1116_p10 = por %p1115_p8, %p1114_p6 }
  0x54   : > { %p1110_p5 = pneg %p1109_p4 }
  0x56   : > { %p1117_p12 = pnand %p1116_p10, %p1110_p5 }
  0x58   : > { %1120 = shalt.err (!%p1117_p12)
}
  0x59   : > { %932 = dma.hbm_to_vmem [thread:$0]  (!%p1421_p13), %s1728_s5, 1024, %s1425_s27, [#allocation11], %s1704_s18, %s1704_s18, %s1705_s12  }
  0x5a   : > { %s33_s17 = sadd.s32 1, %s1269_s9  ;;  %s36_s22 = sadd.s32 1, %s1273_s10 }
  0x5b   : > { %p34_p2 = scmp.ge.s32.totalorder %s33_s17, 2  ;;  %s40_s7 = ssub.s32 1, %s1273_s10 }
  0x5c   : > { %s41_s24 = smul.u32 %s1269_s9, %s40_s7  ;;  %s49_s15 = sadd.s32 1, %s1257_s29 }
  0x5d   : > { %s1764_s17 = smov (%p34_p2, %s33_s17), 0  ;;  %s1766_s22 = smov (!%p34_p2, %s36_s22), %s1273_s10 }
  0x5e   : > { %s42_s13 = sadd.s32 %s1273_s10, %s41_s24  ;;  %p56_p1 = scmp.ne.s32.totalorder %s1257_s29, %s1253_s28 }
  0x5f   : > { %p38_p3 = scmp.ge.s32.totalorder %s1766_s22, 2  ;;  %p57_p7 = scmp.eq.s32.totalorder %s1277_s11, 0 }
  0x60   : > { %s198_s20 = smul.u32 %s1269_s9, %s1273_s10  ;;  %p943_p13 = scmp.lt.s32.totalorder %s1277_s11, 4 }
  0x61   : > { %s1768_s22 = smov (%p38_p3, %s1766_s22), 0  ;;  %p1497_p9 = por %p57_p7, %p56_p1 }
  0x62   : > { %s278_s23 = sand.u32 1, %s1257_s29   ;;  %s43_s21 = ssub.s32 1, %s1768_s22 }
  0x63   : > { %s199_s4 = smul.u32 %s1768_s22, %s1764_s17  ;;  %s815_s24 = sshll.u32 %s278_s23, 3 }
  0x64   : > { %s44_s6 = smul.u32 %s43_s21, %s1764_s17  ;;  %s854_s1 = sshll.u32 %s42_s13, 7 }
  0x65   : > { %s200_s7 = ssub.s32 %s198_s20, %s199_s4  ;;  %s1730_s5 = sadd.s32 1, %s1245_s26 }
  0x66   : > { %s45_s18 = sadd.s32 %s44_s6, %s1768_s22  ;;  %p201_p11 = scmp.eq.s32.totalorder %s200_s7, 0 }
  0x67   : > { %s46_s12 = ssub.s32 %s42_s13, %s45_s18  ;;  %s1518_s8 = scalar_lea.hbm %s1686_s0, %s854_s1 }
  0x68   : > { %p47_p0 = scmp.eq.s32.totalorder %s46_s12, 0  ;;  %s282_s20 = scalar_lea.vmem [#allocation7], %s815_s24 }
  0x69   : > { %s1510_s10 = scalar_select %p201_p11, %s1245_s26, %s1730_s5  }
  0x6a   : > { %s1513_s9 = scalar_select %p47_p0, %s1257_s29, %s49_s15  }
  0x6b   : > { %s292_s21 = sshll.u32 %s282_s20, 4  ;;  %p1526_p4 = pnand %p943_p13, %p1497_p9  ;;  %s1520_s21 = int_to_ptr.vmem [resolvable:$true] %s292_s21 }
  0x6c   : > { %s1530_s18 = scalar_lea.sflag [#allocation8], %s278_s23  ;;  %s1121_s1 = scalar_lea.hbm %s1518_s8, 128 }
  0x6d   : > { %p1122_p5 = scmp.ne.s32.totalorder %s1518_s8, %s1121_s1  ;;  %p1123_p6 = pneg %p1526_p4 }
  0x6e   : > { %s1126_s12 = scalar_lea.hbm %s1686_s0, 256  ;;  %p1127_p12 = scmp.lt.u32.totalorder %s1518_s8, %s1686_s0 }
  0x6f   : > { %p1124_p8 = pnand %p1123_p6, %p1122_p5  ;;  %p1128_p2 = scmp.lt.u32.totalorder %s1126_s12, %s1121_s1 }
  0x70   : > { %p1130_p3 = scmp.lt.u32.totalorder %s1121_s1, %s1518_s8 }
  0x71   : > { %p1125_p10 = pneg %p1124_p8  ;;  %p1129_p1 = por %p1128_p2, %p1127_p12 }
  0x73   : > { %p1131_p7 = por %p1130_p3, %p1129_p1 }
  0x75   : > { %p1132_p13 = pnand %p1131_p7, %p1125_p10 }
  0x77   : > { %1135 = shalt.err (!%p1132_p13)
}
  0x78   : > { %s1136_s27 = scalar_lea.vmem %s1520_s21, 128  ;;  %s1283_s23 = smov [#allocation7]  }
  0x79   : > { %p1137_p9 = scmp.ne.s32.totalorder %s1520_s21, %s1136_s27  ;;  %s1141_s4 = sshll.u32 %s1283_s23, 4  ;;  %s1142_s4 = int_to_ptr.vmem [resolvable:$false] %s1141_s4 }
  0x7a   : > { %s1143_s6 = scalar_lea.vmem %s1142_s4, 256  ;;  %p1144_p5 = scmp.lt.s32.totalorder %s1520_s21, %s1142_s4 }
  0x7b   : > { %p1139_p11 = pnand %p1137_p9, %p1123_p6  ;;  %p1145_p8 = scmp.lt.s32.totalorder %s1143_s6, %s1136_s27 }
  0x7d   : > { %p1140_p0 = pneg %p1139_p11  ;;  %p1146_p12 = por %p1145_p8, %p1144_p5 }
  0x7f   : > { %p1147_p2 = pnand %p1146_p12, %p1140_p0 }
  0x81   : > { %1150 = shalt.err (!%p1147_p2)
}
  0x82   : > { %s1732_s7 = smov 4   ;;  %s1733_s24 = smov 64  }
  0x83   : > { %936 = dma.hbm_to_vmem [thread:$0]  (!%p1526_p4), %s1518_s8, 128, %s1520_s21, %s1530_s18, %s1733_s24, %s1733_s24, %s1732_s7  }
  0x84   : > { %p1734_p6 = scmp.ne.s32.totalorder %s1725_s19, 0 }
  0x85   : > { %s306_s20 = sand.u32 (!%p1734_p6), 1, %s1253_s28   ;;  %p1735_p10 = scmp.ne.s32.totalorder (!%p1734_p6), %s1720_s16, 0 }
  0x86   : > { %304 = sbr.rel (%p1734_p6) target bundleno = 761 (0x2f9), region = 48  ;;  %s1564_s1 = sshll.u32 (!%p1734_p6), %s306_s20, 3 }
  0x87   : > { %s307_s2 = scalar_lea.sflag (!%p1734_p6), [#allocation8], %s306_s20  ;;  %s310_s3 = scalar_lea.vmem (!%p1734_p6), [#allocation7], %s1564_s1 }
  0x8d   : > { %1224 = dma.done.wait (%p1735_p10), %s307_s2, 128  }
  0x8e   : > { %1226 = vsyncadd (%p1735_p10), %s307_s2, 4294967168  ;;  %p1736_p1 = scmp.ne.s32.totalorder %s1719_s14, 0 }
  0x90   : > { %1228 = dma.done.wait (%p1736_p1), [#allocation11], 2048  }
  0x91   : > { %1230 = vsyncadd (%p1736_p1), [#allocation11], 4294965248  ;;  %s1737_s8 = sld [smem:[#allocation18_spill]]  ;;  %s346_s19 = sand.u32 1, %s1241_s25  }
  0x92   : > { %s823_s21 = sshll.u32 %s1261_s30, 4  ;;  %s822_s5 = sshll.u32 %s346_s19, 4 }
  0x93   : > { %p358_p3 = scmp.eq.s32.totalorder %s1261_s30, 0  ;;  %s1583_s16 = scalar_lea.vmem [#allocation13], %s822_s5 }
  0x97   : > { %p357_p4 = scmp.eq.s32.totalorder %s1737_s8, 0 }
  0x99   : > { %p359_p7 = pnand %p358_p3, %p357_p4 }
  0x9a   : > { %v1284_v0 = vmov (!%p359_p7), 0.0  }
  0x9b   : > { %362 = sbr.rel (%p359_p7) target bundleno = 162 (0xa2), region = 64  ;;  %363 = vst [vmem:[#allocation3] sm:$0x1] (!%p359_p7), %v1284_v0  ;;  %364 = vst [vmem:[#allocation4] sm:$0x1] (!%p359_p7), %v1284_v0 }
  0xa2 PF: > { %s1738_s14 = sld [smem:[#allocation18_spill]] }
  0xa8   : > { %p824_p13 = scmp.ne.s32.totalorder %s1738_s14, 0 }
  0xa9   : > { %v1046_v1 = vld [vmem:[#allocation10] sm:$0xff] (!%p824_p13)   ;;  %v1285_v2 = vmov (!%p824_p13), 0.0   ;;  %v1047_v3 = vld [vmem:[#allocation10 + $0x8] sm:$0xff] (!%p824_p13)   ;;  %vm1286_vm0 = vmmov (!%p824_p13), 0   ;;  %v1048_v4 = vld [vmem:[#allocation10 + $0x10] sm:$0xff] (!%p824_p13)   ;;  %s491_s18 = sshra.s32 (!%p824_p13), %s823_s21, 4 }
  0xaa   : > { %367 = sbr.rel (%p824_p13) target bundleno = 435 (0x1b3), region = 68  ;;  %874 = vmatprep.subr.bf16.mxu0 (!%p824_p13), %v1285_v2  ;;  %890 = vmatprep.mubr.msk.bf16.mxu0 (!%p824_p13), %vm1286_vm0, %v1285_v2  ;;  %v1049_v5 = vld [vmem:[#allocation10 + $0x18] sm:$0xff] (!%p824_p13)   ;;  %v1050_v6 = vld [vmem:[#allocation10 + $0x20] sm:$0xff] (!%p824_p13)   ;;  %v1051_v7 = vld [vmem:[#allocation10 + $0x28] sm:$0xff] (!%p824_p13)   ;;  %s1739_s13 = sld [smem:[#allocation24_spill]] (!%p824_p13) }
  0xab   : > { %875 = vmatpush3.bf16.msra.mxu0 (!%p824_p13), %v1046_v1  ;;  %v1052_v8 = vld [vmem:[#allocation10 + $0x30] sm:$0xff] (!%p824_p13)   ;;  %v1053_v9 = vld [vmem:[#allocation10 + $0x38] sm:$0xff] (!%p824_p13)   ;;  %s835_s27 = sshll.u32 (!%p824_p13), %s491_s18, 3  ;;  %v496_v32 = vld [vmem:[#allocation3] sm:$0x1] (!%p824_p13) }
  0xac   : > { %876 = vmatprep.subr.bf16.mxu0 (!%p824_p13), %v1285_v2  ;;  %v1054_v10 = vld [vmem:[%s310_s3] sm:$0xff] (!%p824_p13)   ;;  %s494_s23 = scalar_lea.vmem (!%p824_p13), [#allocation2], %s835_s27  ;;  %v506_v35 = vld [vmem:[#allocation4] sm:$0x1] (!%p824_p13) }
  0xaf   : > { %877 = vmatpush3.bf16.msra.mxu0 (!%p824_p13), %v1047_v3 }
  0xb0   : > { %878 = vmatprep.subr.bf16.mxu0 (!%p824_p13), %v1285_v2  ;;  %v834_v11 = vld [vmem:[%s1739_s13] ss:$0 sm:$0xff] (!%p824_p13) }
  0xb3   : > { %879 = vmatpush3.bf16.msra.mxu0 %v1048_v4 }
  0xb4   : > { %880 = vmatprep.subr.bf16.mxu0 %v1285_v2 }
  0xb7   : > { %881 = vmatpush3.bf16.msra.mxu0 %v1049_v5 }
  0xb8   : > { %882 = vmatprep.subr.bf16.mxu0 %v1285_v2 }
  0xbb   : > { %883 = vmatpush3.bf16.msra.mxu0 %v1050_v6 }
  0xbc   : > { %884 = vmatprep.subr.bf16.mxu0 %v1285_v2 }
  0xbf   : > { %885 = vmatpush3.bf16.msra.mxu0 %v1051_v7 }
  0xc0   : > { %886 = vmatprep.subr.bf16.mxu0 %v1285_v2 }
  0xc3   : > { %887 = vmatpush3.bf16.msra.mxu0 %v1052_v8 }
  0xc4   : > { %888 = vmatprep.subr.bf16.mxu0 %v1285_v2 }
  0xc7   : > { %889 = vmatpush3.bf16.msra.mxu0 %v1053_v9 }
  0xca   : > { %891 = vmatmul.mubr.bf16.vlgmr.msra.gmra.mrb[0].mxu0 %v1054_v10 }
 0x19d   : > { %v474_v12 = vpop.f32.mrb[0].mxu0 }
 0x19e   : > { %v892_v13 = vpop.f32.mrb[1].mxu0  ;;  %v488_v14 = vadd.f32 %v834_v11, %v474_v12  ;;  %v507_v16 = vmul.f32 %v474_v12, %v474_v12 }
 0x19f   : > { %v477_v15 = vpop.f32.mrb[2].mxu0 }
 0x1a0   : > { %v489_v17 = vadd.f32 %v834_v11, %v477_v15  ;;  %v497_v18 = vadd.f32 %v477_v15, %v474_v12  ;;  %v508_v19 = vmul.f32 %v477_v15, %v477_v15  ;;  %v893_v20 = vpop.f32.mrb[3].mxu0 }
 0x1a2   : > { %v490_v21 = vpack.c.bf16 %v489_v17, %v488_v14  ;;  %v498_v22 = vrot.slane %v497_v18, 4  ;;  %v509_v23 = vadd.f32 %v508_v19, %v507_v16 }
 0x1a4   : > { %495 = vst [vmem:[%s494_s23] sm:$0xff] %v490_v21  ;;  %v499_v24 = vadd.f32 %v498_v22, %v497_v18  ;;  %v510_v25 = vrot.slane %v509_v23, 4 }
 0x1a6   : > { %v500_v26 = vrot.slane %v499_v24, 2  ;;  %v511_v27 = vadd.f32 %v510_v25, %v509_v23 }
 0x1a8   : > { %v501_v28 = vadd.f32 %v500_v26, %v499_v24  ;;  %v512_v29 = vrot.slane %v511_v27, 2 }
 0x1aa   : > { %v502_v30 = vrot.slane %v501_v28, 1  ;;  %v513_v31 = vadd.f32 %v512_v29, %v511_v27 }
 0x1ac   : > { %v503_v33 = vadd.f32 %v502_v30, %v501_v28  ;;  %v514_v34 = vrot.slane %v513_v31, 1 }
 0x1ae   : > { %v504_v36 = vadd.f32 %v503_v33, %v496_v32  ;;  %v515_v37 = vadd.f32 %v514_v34, %v513_v31 }
 0x1b0   : > { %505 = vst [vmem:[#allocation3] sm:$0x1] %v504_v36  ;;  %v516_v38 = vadd.f32 %v515_v37, %v506_v35 }
 0x1b2   : > { %517 = vst [vmem:[#allocation4] sm:$0x1] %v516_v38 }
 0x1b3 PF: > { %s1740_s4 = sld [smem:[#allocation18_spill]] }
 0x1b9   : > { %p518_p9 = scmp.eq.s32.totalorder %s1740_s4, 1 }
 0x1bb   : > { %p519_p11 = pnand %p518_p9, %p358_p3 }
 0x1bc   : > { %v523_v39 = vld [vmem:[#allocation3] sm:$0x1] (!%p519_p11)  ;;  %v525_v40 = vld [vmem:[#allocation4] sm:$0x1] (!%p519_p11)  ;;  %s1741_s24 = sld [smem:[#allocation24_spill]] (!%p519_p11)  ;;  %s1742_s2 = sld [smem:[#allocation25_spill]] (!%p519_p11) }
 0x1bd   : > { %522 = sbr.rel (%p519_p11) target bundleno = 473 (0x1d9), region = 72  ;;  %v524_v41 = vmul.f32 (!%p519_p11), 0.041666668, %v523_v39  ;;  %v526_v42 = vmul.f32 (!%p519_p11), 0.041666668, %v525_v40  ;;  %s1743_s5 = sld [smem:[#allocation26_spill]] (!%p519_p11) }
 0x1bf   : > { %v527_v43 = vmul.f32 (!%p519_p11), %v524_v41, %v524_v41 }
 0x1c1   : > { %v528_v44 = vsub.f32 (!%p519_p11), %v526_v42, %v527_v43 }
 0x1c2   : > { %v536_v47 = vld [vmem:[%s1741_s24] sm:$0x1] (!%p519_p11) }
 0x1c3   : > { %v529_v45 = vmax.f32 (!%p519_p11), %v528_v44, 0.0  ;;  %v530_v48 = vld [vmem:[%s1742_s2] sm:$0x1] (!%p519_p11)  ;;  %v537_v49 = vadd.f32 (!%p519_p11), %v536_v47, %v524_v41 }
 0x1c4   : > { %v535_v52 = vld [vmem:[%s1743_s5] sm:$0x1] }
 0x1c5   : > { %v531_v46 = vadd.f32 1e-05, %v529_v45 }
 0x1c7   : > { %1055 = vrsqrt.f32 %v531_v46 }
 0x1d1   : > { %v1056_v50 = vpop.eup %1055 }
 0x1d2   : > { %v533_v51 = vmul.f32 %v1056_v50, %v530_v48 }
 0x1d4   : > { %534 = vst [vmem:[#allocation5] sm:$0x1] %v533_v51  ;;  %v538_v53 = vmul.f32 %v537_v49, %v533_v51 }
 0x1d6   : > { %v539_v54 = vsub.f32 %v535_v52, %v538_v53 }
 0x1d8   : > { %540 = vst [vmem:[#allocation6] sm:$0x1] %v539_v54 }
 0x1d9 PF: > { %s1744_s14 = sld [smem:[#allocation18_spill]] }
 0x1df   : > { %p836_p0 = scmp.ne.s32.totalorder %s1744_s14, 1 }
 0x1e0   : > { %v1057_v55 = vld [vmem:[#allocation12] sm:$0xff] (!%p836_p0)   ;;  %v1287_v56 = vmov (!%p836_p0), 0.0   ;;  %v1058_v57 = vld [vmem:[#allocation12 + $0x8] sm:$0xff] (!%p836_p0)   ;;  %vm1288_vm1 = vmmov (!%p836_p0), 0   ;;  %s544_s18 = sshra.s32 (!%p836_p0), %s823_s21, 4  ;;  %v1059_v58 = vld [vmem:[#allocation12 + $0x10] sm:$0xff] (!%p836_p0)  }
 0x1e1   : > { %543 = sbr.rel (%p836_p0) target bundleno = 730 (0x2da), region = 76  ;;  %894 = vmatprep.subr.bf16.mxu0 (!%p836_p0), %v1287_v56  ;;  %910 = vmatprep.mubr.msk.bf16.mxu0 (!%p836_p0), %vm1288_vm1, %v1287_v56  ;;  %s837_s12 = sshll.u32 (!%p836_p0), %s544_s18, 3  ;;  %v1060_v59 = vld [vmem:[#allocation12 + $0x18] sm:$0xff] (!%p836_p0)   ;;  %v1061_v63 = vld [vmem:[#allocation12 + $0x20] sm:$0xff] (!%p836_p0)   ;;  %v838_v0 = vld [vmem:[#allocation5] ss:$0 sm:$0xff] (!%p836_p0) }
 0x1e2   : > { %895 = vmatpush3.bf16.msra.mxu0 (!%p836_p0), %v1057_v55  ;;  %s547_s15 = scalar_lea.vmem (!%p836_p0), [#allocation2], %s837_s12  ;;  %v1062_v3 = vld [vmem:[#allocation12 + $0x28] sm:$0xff] (!%p836_p0)   ;;  %v1063_v7 = vld [vmem:[#allocation12 + $0x30] sm:$0xff] (!%p836_p0)   ;;  %v1064_v10 = vld [vmem:[#allocation12 + $0x38] sm:$0xff] (!%p836_p0)   ;;  %s1745_s27 = sld [smem:[#allocation28_spill]] (!%p836_p0) }
 0x1e3   : > { %896 = vmatprep.subr.bf16.mxu0 (!%p836_p0), %v1287_v56  ;;  %v548_v60 = vld [vmem:[%s547_s15] sm:$0xff] (!%p836_p0)  ;;  %v839_v4 = vld [vmem:[#allocation6] ss:$0 sm:$0xff] (!%p836_p0) }
 0x1e4   : > { %v549_v61 = vunpack.c.l.bf16 (!%p836_p0), %v548_v60  ;;  %v550_v62 = vunpack.c.h.bf16 (!%p836_p0), %v548_v60 }
 0x1e6   : > { %897 = vmatpush3.bf16.msra.mxu0 (!%p836_p0), %v1058_v57  ;;  %v558_v1 = vmul.f32 (!%p836_p0), %v838_v0, %v549_v61  ;;  %v559_v2 = vmul.f32 (!%p836_p0), %v838_v0, %v550_v62 }
 0x1e7   : > { %898 = vmatprep.subr.bf16.mxu0 (!%p836_p0), %v1287_v56 }
 0x1e8   : > { %v567_v5 = vadd.f32 %v839_v4, %v558_v1  ;;  %v568_v6 = vadd.f32 %v839_v4, %v559_v2  ;;  %v840_v12 = vld [vmem:[%s1745_s27] ss:$0 sm:$0xff] }
 0x1ea   : > { %899 = vmatpush3.bf16.msra.mxu0 %v1059_v58  ;;  %v569_v8 = vmax.f32 %v567_v5, 0.0  ;;  %v570_v9 = vmax.f32 %v568_v6, 0.0 }
 0x1eb   : > { %900 = vmatprep.subr.bf16.mxu0 %v1287_v56 }
 0x1ec   : > { %v571_v11 = vpack.c.bf16 %v570_v9, %v569_v8 }
 0x1ee   : > { %901 = vmatpush3.bf16.msra.mxu0 %v1060_v59 }
 0x1ef   : > { %902 = vmatprep.subr.bf16.mxu0 %v1287_v56 }
 0x1f2   : > { %903 = vmatpush3.bf16.msra.mxu0 %v1061_v63 }
 0x1f3   : > { %904 = vmatprep.subr.bf16.mxu0 %v1287_v56 }
 0x1f6   : > { %905 = vmatpush3.bf16.msra.mxu0 %v1062_v3 }
 0x1f7   : > { %906 = vmatprep.subr.bf16.mxu0 %v1287_v56 }
 0x1fa   : > { %907 = vmatpush3.bf16.msra.mxu0 %v1063_v7 }
 0x1fb   : > { %908 = vmatprep.subr.bf16.mxu0 %v1287_v56 }
 0x1fe   : > { %909 = vmatpush3.bf16.msra.mxu0 %v1064_v10 }
 0x201   : > { %911 = vmatmul.mubr.bf16.vlgmr.msra.gmra.mrb[0].mxu0 %v571_v11 }
 0x2d4   : > { %v677_v13 = vpop.f32.mrb[0].mxu0 }
 0x2d5   : > { %v678_v14 = vadd.f32 %v840_v12, %v677_v13  ;;  %v912_v15 = vpop.f32.mrb[1].mxu0 }
 0x2d6   : > { %v680_v16 = vpop.f32.mrb[2].mxu0 }
 0x2d7   : > { %684 = vst [vmem:[%s1583_s16] sm:$0xff] %v678_v14  ;;  %v681_v17 = vadd.f32 %v840_v12, %v680_v16  ;;  %v913_v18 = vpop.f32.mrb[3].mxu0 }
 0x2d9   : > { %685 = vst [vmem:[%s1583_s16 + $0x8] sm:$0xff] %v681_v17 }
 0x2da PF: > { %s1746_s23 = sld [smem:[#allocation18_spill]]  ;;  %s1747_s4 = sld [smem:[#allocation21_spill]] }
 0x2db   : > { %s701_s7 = sshll.u32 %s1583_s16, 4  ;;  %s1748_s2 = sld [smem:[#allocation29_spill]]  ;;  %s1616_s7 = int_to_ptr.vmem [resolvable:$true] %s701_s7 }
 0x2dc   : > { %s1625_s8 = scalar_lea.sflag [#allocation9], %s346_s19  ;;  %s1151_s5 = scalar_lea.vmem %s1616_s7, 256 }
 0x2dd   : > { %p1152_p5 = scmp.ne.s32.totalorder %s1616_s7, %s1151_s5 }
 0x2e0   : > { %s694_s6 = smul.u32 %s1261_s30, %s1746_s23  ;;  %p1749_p8 = scmp.ne.s32.totalorder %s1747_s4, 0 }
 0x2e1   : > { %s1289_s30 = smov [#allocation13]  }
 0x2e2   : > { %s855_s24 = sshll.u32 %s694_s6, 8  ;;  %p1153_p12 = pnand %p1152_p5, %p1749_p8 }
 0x2e3   : > { %s1621_s3 = scalar_lea.hbm %s1748_s2, %s855_s24  ;;  %s1155_s16 = sshll.u32 %s1289_s30, 4  ;;  %s1156_s16 = int_to_ptr.vmem [resolvable:$false] %s1155_s16 }
 0x2e4   : > { %p1154_p2 = pneg %p1153_p12  ;;  %s1157_s14 = scalar_lea.vmem %s1156_s16, 512 }
 0x2e5   : > { %p1158_p6 = scmp.lt.s32.totalorder %s1616_s7, %s1156_s16  ;;  %p1159_p10 = scmp.lt.s32.totalorder %s1157_s14, %s1151_s5 }
 0x2e7   : > { %p1160_p1 = por %p1159_p10, %p1158_p6 }
 0x2e9   : > { %p1161_p4 = pnand %p1160_p1, %p1154_p2 }
 0x2eb   : > { %1164 = shalt.err (!%p1161_p4)
}
 0x2ec   : > { %s1165_s19 = scalar_lea.hbm %s1621_s3, 256  ;;  %s1169_s15 = scalar_lea.hbm %s1748_s2, 512 }
 0x2ed   : > { %p1166_p3 = scmp.ne.s32.totalorder %s1621_s3, %s1165_s19  ;;  %p1170_p9 = scmp.lt.u32.totalorder %s1621_s3, %s1748_s2 }
 0x2ee   : > { %p1171_p11 = scmp.lt.u32.totalorder %s1169_s15, %s1165_s19  ;;  %p1173_p5 = scmp.lt.u32.totalorder %s1165_s19, %s1621_s3 }
 0x2ef   : > { %p1167_p7 = pnand %p1166_p3, %p1749_p8 }
 0x2f0   : > { %p1172_p0 = por %p1171_p11, %p1170_p9 }
 0x2f1   : > { %p1168_p13 = pneg %p1167_p7 }
 0x2f2   : > { %p1174_p12 = por %p1173_p5, %p1172_p0 }
 0x2f4   : > { %p1175_p2 = pnand %p1174_p12, %p1168_p13 }
 0x2f6   : > { %1178 = shalt.err (!%p1175_p2)
}
 0x2f7   : > { %s1290_s27 = smov 128   ;;  %s1291_s23 = smov 8  }
 0x2f8   : > { %924 = dma.vmem_to_hbm [thread:$0]  (%p1749_p8), %s1616_s7, 256, %s1621_s3, %s1625_s8, %s1290_s27, %s1290_s27, %s1291_s23  }
 0x2f9 PF: > { %s1750_s6 = sld [smem:[#allocation17_spill]]  ;;  %s1751_s24 = sld [smem:[#allocation22_spill]] }
 0x2fa   : > { %p946_p6 = scmp.ge.s32.totalorder %s1277_s11, 2 }
 0x2ff   : > { %s716_s20 = sand.u32 1, %s1750_s6   ;;  %p1752_p10 = scmp.ne.s32.totalorder %s1751_s24, 0 }
 0x300   : > { %s717_s1 = scalar_lea.sflag [#allocation9], %s716_s20 }
 0x301   : > { %p938_p1 = pnand %p946_p6, %p1752_p10 }
 0x303   : > { %1232 = dma.done.wait (!%p938_p1), %s717_s1, 256  }
 0x304   : > { %1234 = vsyncadd (!%p938_p1), %s717_s1, 4294967040  ;;  %s24_s11 = sadd.s32 1, %s1277_s11   ;;  %s1753_s30 = sld [smem:[#allocation19_spill]] }
 0x305   : > { %p21_p4 = scmp.ge.s32.totalorder %s24_s11, 6   ;;  %s1754_s8 = sld [smem:[#allocation20_spill]] }
 0x306   : > { %s1755_s24 = smov %s1241_s25  ;;  %s1756_s25 = smov %s1245_s26 }
 0x307   : > { %s1757_s26 = smov %s1510_s10  ;;  %s1758_s27 = smov %s1253_s28 }
 0x308   : > { %s1759_s28 = smov %s1257_s29  ;;  %s1760_s29 = smov %s1513_s9 }
 0x309   : > { %s1761_s9 = smov %s1764_s17  ;;  %s1762_s10 = smov %s1768_s22 }
 0x30a   :  { %23 = sbr.rel (!%p21_p4) target bundleno = 18 (0x12), region = 119 }
 0x311   :  { %722 = vsyncpa [#allocation8], 1 }
 0x312   :  { %724 = vsyncpa [#allocation8 + $0x1], 1 }
 0x313   :  { %725 = vsyncpa [#allocation11], 1 }
 0x314   :  { %726 = vsyncpa [#allocation9], 1 }
 0x315   :  { %728 = vsyncpa [#allocation9 + $0x1], 1 }

</bundles_post_ra>
